<compile_context>
chip_gen: v7x
topology: tpu7x:2x2x1
jax: 0.10.0
libtpu: 0.0.40
codegen_flags: <defaults>
</compile_context>

<pallas_src>
import jax
import jax.numpy as jnp
from jax.experimental import pallas as pl
from jax.experimental.pallas import tpu as pltpu


# ------------------------------- kernel -------------------------------------

def clip_embedding_kernel(tok_ref, table_hbm, pos_ref, o_ref, gbuf, sem):
    """Gather S embedding rows for one batch element, add positional emb."""
    b = pl.program_id(0)
    seq_len = gbuf.shape[0]

    # Issue all S row-gather DMAs back-to-back; they proceed concurrently with
    # each other and with the pipelined write-back of the previous grid step.
    # Every completion signals the single shared DMA semaphore.
    for s in range(seq_len):
        tok = tok_ref[b, s]                                   # scalar from SMEM
        pltpu.make_async_copy(
            table_hbm.at[pl.ds(tok, 1), :],                   # (1, D) row in HBM
            gbuf.at[pl.ds(s, 1), :],                          # (1, D) slot in VMEM
            sem,
        ).start()

    # Drain the shared semaphore: one wait per issued row.  Waits only use the
    # descriptor's size, so a fixed placeholder source slice is fine.
    for s in range(seq_len):
        pltpu.make_async_copy(
            table_hbm.at[pl.ds(0, 1), :],                     # placeholder src
            gbuf.at[pl.ds(s, 1), :],
            sem,
        ).wait()

    # token embedding + positional embedding (positional block is VMEM-resident).
    o_ref[0] = (gbuf[...] + pos_ref[...]).astype(o_ref.dtype)


# ------------------------------- wrapper ------------------------------------

def clip_embedding_forward(tokens, token_table, pos_emb):
    """tokens: (B, S) int, token_table: (V, D), pos_emb: (S, D) -> (B, S, D)."""
    B, S = tokens.shape
    V, D = token_table.shape
    assert pos_emb.shape == (S, D)

    grid_spec = pltpu.PrefetchScalarGridSpec(
        num_scalar_prefetch=1,                      # tokens -> SMEM before grid
        grid=(B,),
        in_specs=[
            pl.BlockSpec(memory_space=pl.ANY),      # embedding table stays in HBM
            pl.BlockSpec((S, D), lambda b, tok: (0, 0)),   # positional, resident
        ],
        out_specs=pl.BlockSpec((1, S, D), lambda b, tok: (b, 0, 0)),
        scratch_shapes=[
            pltpu.VMEM((S, D), token_table.dtype),  # gather buffer
            pltpu.SemaphoreType.DMA(()),            # one shared DMA semaphore
        ],
    )

    return pl.pallas_call(
        clip_embedding_kernel,
        out_shape=jax.ShapeDtypeStruct((B, S, D), token_table.dtype),
        grid_spec=grid_spec,
        compiler_params=pltpu.CompilerParams(
            dimension_semantics=("parallel",),      # batch steps are independent
        ),
    )(tokens.astype(jnp.int32), token_table, pos_emb)


# --------------------------------- main -------------------------------------

if __name__ == "__main__":
    # Small shapes consistent with the module (real CLIP: V=49408, D=768, S=77).
    VOCAB = 1000
    D_MODEL = 128        # lane-dense last dim
    MAX_TOKENS = 16      # sequence length
    BATCH = 2

    key = jax.random.PRNGKey(0)
    k_tab, k_pos, k_tok = jax.random.split(key, 3)
    token_table = jax.random.normal(k_tab, (VOCAB, D_MODEL), jnp.float32) * 0.02
    pos_emb = jax.random.normal(k_pos, (MAX_TOKENS, D_MODEL), jnp.float32) * 0.02
    tokens = jax.random.randint(k_tok, (BATCH, MAX_TOKENS), 0, VOCAB, jnp.int32)

    out = clip_embedding_forward(tokens, token_table, pos_emb)
    out = jax.block_until_ready(out)

    # Pure-JAX reference: token_embeddings(tokens) + positional_embeddings
    ref = token_table[tokens] + pos_emb[None, :, :]

    assert out.shape == (BATCH, MAX_TOKENS, D_MODEL)
    assert bool(jnp.all(jnp.isfinite(out)))
    assert jnp.allclose(out, ref, atol=1e-6, rtol=1e-6)
    print("KERNEL_OK")
</pallas_src>

<mosaic_0001>
module attributes {stable_mosaic.version = 11 : i64} {
  func.func @clip_embedding_kernel(%arg0: i32, %arg1: memref<2x16xi32, #tpu.memory_space<smem>>, %arg2: memref<1000x128xf32, #tpu.memory_space<any>>, %arg3: memref<16x128xf32, #tpu.memory_space<vmem>>, %arg4: memref<1x16x128xf32, #tpu.memory_space<vmem>>, %arg5: memref<16x128xf32, #tpu.memory_space<vmem>>, %arg6: memref<!tpu.dma_semaphore, #tpu.memory_space<semaphore_mem>>) attributes {dimension_semantics = [#tpu.dimension_semantics<parallel>], iteration_bounds = array<i64: 2>, scalar_prefetch = 1 : i64, scratch_operands = 2 : i64, tpu.core_type = #tpu.core_type<tc>, window_params = [{}, {pipeline_mode = #tpu.pipeline_mode<synchronous>, transform_indices = @transform_1, window_bounds = array<i64: 16, 128>}, {transform_indices = @transform_2, window_bounds = array<i64: 1, 16, 128>}]} {
    %0 = arith.index_cast %arg0 : i32 to index
    %c0 = arith.constant 0 : index
    %1 = memref.load %arg1[%0, %c0] : memref<2x16xi32, #tpu.memory_space<smem>>
    %c0_i32 = arith.constant 0 : i32
    %2 = tpu.memref_slice %arg2[%1, %c0_i32] : memref<1000x128xf32, #tpu.memory_space<any>> -> memref<1x128xf32, #tpu.memory_space<any>>
    %c0_i32_0 = arith.constant 0 : i32
    %c0_i32_1 = arith.constant 0 : i32
    %3 = tpu.memref_slice %arg5[%c0_i32_0, %c0_i32_1] : memref<16x128xf32, #tpu.memory_space<vmem>> -> memref<1x128xf32, #tpu.memory_space<vmem>>
    tpu.enqueue_dma source(%2 : memref<1x128xf32, #tpu.memory_space<any>>) target(%3 : memref<1x128xf32, #tpu.memory_space<vmem>>) target_semaphore(%arg6 : memref<!tpu.dma_semaphore, #tpu.memory_space<semaphore_mem>>)
    %4 = arith.index_cast %arg0 : i32 to index
    %c1 = arith.constant 1 : index
    %5 = memref.load %arg1[%4, %c1] : memref<2x16xi32, #tpu.memory_space<smem>>
    %c0_i32_2 = arith.constant 0 : i32
    %6 = tpu.memref_slice %arg2[%5, %c0_i32_2] : memref<1000x128xf32, #tpu.memory_space<any>> -> memref<1x128xf32, #tpu.memory_space<any>>
    %c1_i32 = arith.constant 1 : i32
    %c0_i32_3 = arith.constant 0 : i32
    %7 = tpu.memref_slice %arg5[%c1_i32, %c0_i32_3] : memref<16x128xf32, #tpu.memory_space<vmem>> -> memref<1x128xf32, #tpu.memory_space<vmem>>
    tpu.enqueue_dma source(%6 : memref<1x128xf32, #tpu.memory_space<any>>) target(%7 : memref<1x128xf32, #tpu.memory_space<vmem>>) target_semaphore(%arg6 : memref<!tpu.dma_semaphore, #tpu.memory_space<semaphore_mem>>)
    %8 = arith.index_cast %arg0 : i32 to index
    %c2 = arith.constant 2 : index
    %9 = memref.load %arg1[%8, %c2] : memref<2x16xi32, #tpu.memory_space<smem>>
    %c0_i32_4 = arith.constant 0 : i32
    %10 = tpu.memref_slice %arg2[%9, %c0_i32_4] : memref<1000x128xf32, #tpu.memory_space<any>> -> memref<1x128xf32, #tpu.memory_space<any>>
    %c2_i32 = arith.constant 2 : i32
    %c0_i32_5 = arith.constant 0 : i32
    %11 = tpu.memref_slice %arg5[%c2_i32, %c0_i32_5] : memref<16x128xf32, #tpu.memory_space<vmem>> -> memref<1x128xf32, #tpu.memory_space<vmem>>
    tpu.enqueue_dma source(%10 : memref<1x128xf32, #tpu.memory_space<any>>) target(%11 : memref<1x128xf32, #tpu.memory_space<vmem>>) target_semaphore(%arg6 : memref<!tpu.dma_semaphore, #tpu.memory_space<semaphore_mem>>)
    %12 = arith.index_cast %arg0 : i32 to index
    %c3 = arith.constant 3 : index
    %13 = memref.load %arg1[%12, %c3] : memref<2x16xi32, #tpu.memory_space<smem>>
    %c0_i32_6 = arith.constant 0 : i32
    %14 = tpu.memref_slice %arg2[%13, %c0_i32_6] : memref<1000x128xf32, #tpu.memory_space<any>> -> memref<1x128xf32, #tpu.memory_space<any>>
    %c3_i32 = arith.constant 3 : i32
    %c0_i32_7 = arith.constant 0 : i32
    %15 = tpu.memref_slice %arg5[%c3_i32, %c0_i32_7] : memref<16x128xf32, #tpu.memory_space<vmem>> -> memref<1x128xf32, #tpu.memory_space<vmem>>
    tpu.enqueue_dma source(%14 : memref<1x128xf32, #tpu.memory_space<any>>) target(%15 : memref<1x128xf32, #tpu.memory_space<vmem>>) target_semaphore(%arg6 : memref<!tpu.dma_semaphore, #tpu.memory_space<semaphore_mem>>)
    %16 = arith.index_cast %arg0 : i32 to index
    %c4 = arith.constant 4 : index
    %17 = memref.load %arg1[%16, %c4] : memref<2x16xi32, #tpu.memory_space<smem>>
    %c0_i32_8 = arith.constant 0 : i32
    %18 = tpu.memref_slice %arg2[%17, %c0_i32_8] : memref<1000x128xf32, #tpu.memory_space<any>> -> memref<1x128xf32, #tpu.memory_space<any>>
    %c4_i32 = arith.constant 4 : i32
    %c0_i32_9 = arith.constant 0 : i32
    %19 = tpu.memref_slice %arg5[%c4_i32, %c0_i32_9] : memref<16x128xf32, #tpu.memory_space<vmem>> -> memref<1x128xf32, #tpu.memory_space<vmem>>
    tpu.enqueue_dma source(%18 : memref<1x128xf32, #tpu.memory_space<any>>) target(%19 : memref<1x128xf32, #tpu.memory_space<vmem>>) target_semaphore(%arg6 : memref<!tpu.dma_semaphore, #tpu.memory_space<semaphore_mem>>)
    %20 = arith.index_cast %arg0 : i32 to index
    %c5 = arith.constant 5 : index
    %21 = memref.load %arg1[%20, %c5] : memref<2x16xi32, #tpu.memory_space<smem>>
    %c0_i32_10 = arith.constant 0 : i32
    %22 = tpu.memref_slice %arg2[%21, %c0_i32_10] : memref<1000x128xf32, #tpu.memory_space<any>> -> memref<1x128xf32, #tpu.memory_space<any>>
    %c5_i32 = arith.constant 5 : i32
    %c0_i32_11 = arith.constant 0 : i32
    %23 = tpu.memref_slice %arg5[%c5_i32, %c0_i32_11] : memref<16x128xf32, #tpu.memory_space<vmem>> -> memref<1x128xf32, #tpu.memory_space<vmem>>
    tpu.enqueue_dma source(%22 : memref<1x128xf32, #tpu.memory_space<any>>) target(%23 : memref<1x128xf32, #tpu.memory_space<vmem>>) target_semaphore(%arg6 : memref<!tpu.dma_semaphore, #tpu.memory_space<semaphore_mem>>)
    %24 = arith.index_cast %arg0 : i32 to index
    %c6 = arith.constant 6 : index
    %25 = memref.load %arg1[%24, %c6] : memref<2x16xi32, #tpu.memory_space<smem>>
    %c0_i32_12 = arith.constant 0 : i32
    %26 = tpu.memref_slice %arg2[%25, %c0_i32_12] : memref<1000x128xf32, #tpu.memory_space<any>> -> memref<1x128xf32, #tpu.memory_space<any>>
    %c6_i32 = arith.constant 6 : i32
    %c0_i32_13 = arith.constant 0 : i32
    %27 = tpu.memref_slice %arg5[%c6_i32, %c0_i32_13] : memref<16x128xf32, #tpu.memory_space<vmem>> -> memref<1x128xf32, #tpu.memory_space<vmem>>
    tpu.enqueue_dma source(%26 : memref<1x128xf32, #tpu.memory_space<any>>) target(%27 : memref<1x128xf32, #tpu.memory_space<vmem>>) target_semaphore(%arg6 : memref<!tpu.dma_semaphore, #tpu.memory_space<semaphore_mem>>)
    %28 = arith.index_cast %arg0 : i32 to index
    %c7 = arith.constant 7 : index
    %29 = memref.load %arg1[%28, %c7] : memref<2x16xi32, #tpu.memory_space<smem>>
    %c0_i32_14 = arith.constant 0 : i32
    %30 = tpu.memref_slice %arg2[%29, %c0_i32_14] : memref<1000x128xf32, #tpu.memory_space<any>> -> memref<1x128xf32, #tpu.memory_space<any>>
    %c7_i32 = arith.constant 7 : i32
    %c0_i32_15 = arith.constant 0 : i32
    %31 = tpu.memref_slice %arg5[%c7_i32, %c0_i32_15] : memref<16x128xf32, #tpu.memory_space<vmem>> -> memref<1x128xf32, #tpu.memory_space<vmem>>
    tpu.enqueue_dma source(%30 : memref<1x128xf32, #tpu.memory_space<any>>) target(%31 : memref<1x128xf32, #tpu.memory_space<vmem>>) target_semaphore(%arg6 : memref<!tpu.dma_semaphore, #tpu.memory_space<semaphore_mem>>)
    %32 = arith.index_cast %arg0 : i32 to index
    %c8 = arith.constant 8 : index
    %33 = memref.load %arg1[%32, %c8] : memref<2x16xi32, #tpu.memory_space<smem>>
    %c0_i32_16 = arith.constant 0 : i32
    %34 = tpu.memref_slice %arg2[%33, %c0_i32_16] : memref<1000x128xf32, #tpu.memory_space<any>> -> memref<1x128xf32, #tpu.memory_space<any>>
    %c8_i32 = arith.constant 8 : i32
    %c0_i32_17 = arith.constant 0 : i32
    %35 = tpu.memref_slice %arg5[%c8_i32, %c0_i32_17] : memref<16x128xf32, #tpu.memory_space<vmem>> -> memref<1x128xf32, #tpu.memory_space<vmem>>
    tpu.enqueue_dma source(%34 : memref<1x128xf32, #tpu.memory_space<any>>) target(%35 : memref<1x128xf32, #tpu.memory_space<vmem>>) target_semaphore(%arg6 : memref<!tpu.dma_semaphore, #tpu.memory_space<semaphore_mem>>)
    %36 = arith.index_cast %arg0 : i32 to index
    %c9 = arith.constant 9 : index
    %37 = memref.load %arg1[%36, %c9] : memref<2x16xi32, #tpu.memory_space<smem>>
    %c0_i32_18 = arith.constant 0 : i32
    %38 = tpu.memref_slice %arg2[%37, %c0_i32_18] : memref<1000x128xf32, #tpu.memory_space<any>> -> memref<1x128xf32, #tpu.memory_space<any>>
    %c9_i32 = arith.constant 9 : i32
    %c0_i32_19 = arith.constant 0 : i32
    %39 = tpu.memref_slice %arg5[%c9_i32, %c0_i32_19] : memref<16x128xf32, #tpu.memory_space<vmem>> -> memref<1x128xf32, #tpu.memory_space<vmem>>
    tpu.enqueue_dma source(%38 : memref<1x128xf32, #tpu.memory_space<any>>) target(%39 : memref<1x128xf32, #tpu.memory_space<vmem>>) target_semaphore(%arg6 : memref<!tpu.dma_semaphore, #tpu.memory_space<semaphore_mem>>)
    %40 = arith.index_cast %arg0 : i32 to index
    %c10 = arith.constant 10 : index
    %41 = memref.load %arg1[%40, %c10] : memref<2x16xi32, #tpu.memory_space<smem>>
    %c0_i32_20 = arith.constant 0 : i32
    %42 = tpu.memref_slice %arg2[%41, %c0_i32_20] : memref<1000x128xf32, #tpu.memory_space<any>> -> memref<1x128xf32, #tpu.memory_space<any>>
    %c10_i32 = arith.constant 10 : i32
    %c0_i32_21 = arith.constant 0 : i32
    %43 = tpu.memref_slice %arg5[%c10_i32, %c0_i32_21] : memref<16x128xf32, #tpu.memory_space<vmem>> -> memref<1x128xf32, #tpu.memory_space<vmem>>
    tpu.enqueue_dma source(%42 : memref<1x128xf32, #tpu.memory_space<any>>) target(%43 : memref<1x128xf32, #tpu.memory_space<vmem>>) target_semaphore(%arg6 : memref<!tpu.dma_semaphore, #tpu.memory_space<semaphore_mem>>)
    %44 = arith.index_cast %arg0 : i32 to index
    %c11 = arith.constant 11 : index
    %45 = memref.load %arg1[%44, %c11] : memref<2x16xi32, #tpu.memory_space<smem>>
    %c0_i32_22 = arith.constant 0 : i32
    %46 = tpu.memref_slice %arg2[%45, %c0_i32_22] : memref<1000x128xf32, #tpu.memory_space<any>> -> memref<1x128xf32, #tpu.memory_space<any>>
    %c11_i32 = arith.constant 11 : i32
    %c0_i32_23 = arith.constant 0 : i32
    %47 = tpu.memref_slice %arg5[%c11_i32, %c0_i32_23] : memref<16x128xf32, #tpu.memory_space<vmem>> -> memref<1x128xf32, #tpu.memory_space<vmem>>
    tpu.enqueue_dma source(%46 : memref<1x128xf32, #tpu.memory_space<any>>) target(%47 : memref<1x128xf32, #tpu.memory_space<vmem>>) target_semaphore(%arg6 : memref<!tpu.dma_semaphore, #tpu.memory_space<semaphore_mem>>)
    %48 = arith.index_cast %arg0 : i32 to index
    %c12 = arith.constant 12 : index
    %49 = memref.load %arg1[%48, %c12] : memref<2x16xi32, #tpu.memory_space<smem>>
    %c0_i32_24 = arith.constant 0 : i32
    %50 = tpu.memref_slice %arg2[%49, %c0_i32_24] : memref<1000x128xf32, #tpu.memory_space<any>> -> memref<1x128xf32, #tpu.memory_space<any>>
    %c12_i32 = arith.constant 12 : i32
    %c0_i32_25 = arith.constant 0 : i32
    %51 = tpu.memref_slice %arg5[%c12_i32, %c0_i32_25] : memref<16x128xf32, #tpu.memory_space<vmem>> -> memref<1x128xf32, #tpu.memory_space<vmem>>
    tpu.enqueue_dma source(%50 : memref<1x128xf32, #tpu.memory_space<any>>) target(%51 : memref<1x128xf32, #tpu.memory_space<vmem>>) target_semaphore(%arg6 : memref<!tpu.dma_semaphore, #tpu.memory_space<semaphore_mem>>)
    %52 = arith.index_cast %arg0 : i32 to index
    %c13 = arith.constant 13 : index
    %53 = memref.load %arg1[%52, %c13] : memref<2x16xi32, #tpu.memory_space<smem>>
    %c0_i32_26 = arith.constant 0 : i32
    %54 = tpu.memref_slice %arg2[%53, %c0_i32_26] : memref<1000x128xf32, #tpu.memory_space<any>> -> memref<1x128xf32, #tpu.memory_space<any>>
    %c13_i32 = arith.constant 13 : i32
    %c0_i32_27 = arith.constant 0 : i32
    %55 = tpu.memref_slice %arg5[%c13_i32, %c0_i32_27] : memref<16x128xf32, #tpu.memory_space<vmem>> -> memref<1x128xf32, #tpu.memory_space<vmem>>
    tpu.enqueue_dma source(%54 : memref<1x128xf32, #tpu.memory_space<any>>) target(%55 : memref<1x128xf32, #tpu.memory_space<vmem>>) target_semaphore(%arg6 : memref<!tpu.dma_semaphore, #tpu.memory_space<semaphore_mem>>)
    %56 = arith.index_cast %arg0 : i32 to index
    %c14 = arith.constant 14 : index
    %57 = memref.load %arg1[%56, %c14] : memref<2x16xi32, #tpu.memory_space<smem>>
    %c0_i32_28 = arith.constant 0 : i32
    %58 = tpu.memref_slice %arg2[%57, %c0_i32_28] : memref<1000x128xf32, #tpu.memory_space<any>> -> memref<1x128xf32, #tpu.memory_space<any>>
    %c14_i32 = arith.constant 14 : i32
    %c0_i32_29 = arith.constant 0 : i32
    %59 = tpu.memref_slice %arg5[%c14_i32, %c0_i32_29] : memref<16x128xf32, #tpu.memory_space<vmem>> -> memref<1x128xf32, #tpu.memory_space<vmem>>
    tpu.enqueue_dma source(%58 : memref<1x128xf32, #tpu.memory_space<any>>) target(%59 : memref<1x128xf32, #tpu.memory_space<vmem>>) target_semaphore(%arg6 : memref<!tpu.dma_semaphore, #tpu.memory_space<semaphore_mem>>)
    %60 = arith.index_cast %arg0 : i32 to index
    %c15 = arith.constant 15 : index
    %61 = memref.load %arg1[%60, %c15] : memref<2x16xi32, #tpu.memory_space<smem>>
    %c0_i32_30 = arith.constant 0 : i32
    %62 = tpu.memref_slice %arg2[%61, %c0_i32_30] : memref<1000x128xf32, #tpu.memory_space<any>> -> memref<1x128xf32, #tpu.memory_space<any>>
    %c15_i32 = arith.constant 15 : i32
    %c0_i32_31 = arith.constant 0 : i32
    %63 = tpu.memref_slice %arg5[%c15_i32, %c0_i32_31] : memref<16x128xf32, #tpu.memory_space<vmem>> -> memref<1x128xf32, #tpu.memory_space<vmem>>
    tpu.enqueue_dma source(%62 : memref<1x128xf32, #tpu.memory_space<any>>) target(%63 : memref<1x128xf32, #tpu.memory_space<vmem>>) target_semaphore(%arg6 : memref<!tpu.dma_semaphore, #tpu.memory_space<semaphore_mem>>)
    %c0_i32_32 = arith.constant 0 : i32
    %c0_i32_33 = arith.constant 0 : i32
    %64 = tpu.memref_slice %arg2[%c0_i32_32, %c0_i32_33] : memref<1000x128xf32, #tpu.memory_space<any>> -> memref<1x128xf32, #tpu.memory_space<any>>
    %c0_i32_34 = arith.constant 0 : i32
    %c0_i32_35 = arith.constant 0 : i32
    %65 = tpu.memref_slice %arg5[%c0_i32_34, %c0_i32_35] : memref<16x128xf32, #tpu.memory_space<vmem>> -> memref<1x128xf32, #tpu.memory_space<vmem>>
    tpu.wait_dma2 semaphore(%arg6 : memref<!tpu.dma_semaphore, #tpu.memory_space<semaphore_mem>>) src(%64 : memref<1x128xf32, #tpu.memory_space<any>>) dst(%65 : memref<1x128xf32, #tpu.memory_space<vmem>>)
    %c0_i32_36 = arith.constant 0 : i32
    %c0_i32_37 = arith.constant 0 : i32
    %66 = tpu.memref_slice %arg2[%c0_i32_36, %c0_i32_37] : memref<1000x128xf32, #tpu.memory_space<any>> -> memref<1x128xf32, #tpu.memory_space<any>>
    %c1_i32_38 = arith.constant 1 : i32
    %c0_i32_39 = arith.constant 0 : i32
    %67 = tpu.memref_slice %arg5[%c1_i32_38, %c0_i32_39] : memref<16x128xf32, #tpu.memory_space<vmem>> -> memref<1x128xf32, #tpu.memory_space<vmem>>
    tpu.wait_dma2 semaphore(%arg6 : memref<!tpu.dma_semaphore, #tpu.memory_space<semaphore_mem>>) src(%66 : memref<1x128xf32, #tpu.memory_space<any>>) dst(%67 : memref<1x128xf32, #tpu.memory_space<vmem>>)
    %c0_i32_40 = arith.constant 0 : i32
    %c0_i32_41 = arith.constant 0 : i32
    %68 = tpu.memref_slice %arg2[%c0_i32_40, %c0_i32_41] : memref<1000x128xf32, #tpu.memory_space<any>> -> memref<1x128xf32, #tpu.memory_space<any>>
    %c2_i32_42 = arith.constant 2 : i32
    %c0_i32_43 = arith.constant 0 : i32
    %69 = tpu.memref_slice %arg5[%c2_i32_42, %c0_i32_43] : memref<16x128xf32, #tpu.memory_space<vmem>> -> memref<1x128xf32, #tpu.memory_space<vmem>>
    tpu.wait_dma2 semaphore(%arg6 : memref<!tpu.dma_semaphore, #tpu.memory_space<semaphore_mem>>) src(%68 : memref<1x128xf32, #tpu.memory_space<any>>) dst(%69 : memref<1x128xf32, #tpu.memory_space<vmem>>)
    %c0_i32_44 = arith.constant 0 : i32
    %c0_i32_45 = arith.constant 0 : i32
    %70 = tpu.memref_slice %arg2[%c0_i32_44, %c0_i32_45] : memref<1000x128xf32, #tpu.memory_space<any>> -> memref<1x128xf32, #tpu.memory_space<any>>
    %c3_i32_46 = arith.constant 3 : i32
    %c0_i32_47 = arith.constant 0 : i32
    %71 = tpu.memref_slice %arg5[%c3_i32_46, %c0_i32_47] : memref<16x128xf32, #tpu.memory_space<vmem>> -> memref<1x128xf32, #tpu.memory_space<vmem>>
    tpu.wait_dma2 semaphore(%arg6 : memref<!tpu.dma_semaphore, #tpu.memory_space<semaphore_mem>>) src(%70 : memref<1x128xf32, #tpu.memory_space<any>>) dst(%71 : memref<1x128xf32, #tpu.memory_space<vmem>>)
    %c0_i32_48 = arith.constant 0 : i32
    %c0_i32_49 = arith.constant 0 : i32
    %72 = tpu.memref_slice %arg2[%c0_i32_48, %c0_i32_49] : memref<1000x128xf32, #tpu.memory_space<any>> -> memref<1x128xf32, #tpu.memory_space<any>>
    %c4_i32_50 = arith.constant 4 : i32
    %c0_i32_51 = arith.constant 0 : i32
    %73 = tpu.memref_slice %arg5[%c4_i32_50, %c0_i32_51] : memref<16x128xf32, #tpu.memory_space<vmem>> -> memref<1x128xf32, #tpu.memory_space<vmem>>
    tpu.wait_dma2 semaphore(%arg6 : memref<!tpu.dma_semaphore, #tpu.memory_space<semaphore_mem>>) src(%72 : memref<1x128xf32, #tpu.memory_space<any>>) dst(%73 : memref<1x128xf32, #tpu.memory_space<vmem>>)
    %c0_i32_52 = arith.constant 0 : i32
    %c0_i32_53 = arith.constant 0 : i32
    %74 = tpu.memref_slice %arg2[%c0_i32_52, %c0_i32_53] : memref<1000x128xf32, #tpu.memory_space<any>> -> memref<1x128xf32, #tpu.memory_space<any>>
    %c5_i32_54 = arith.constant 5 : i32
    %c0_i32_55 = arith.constant 0 : i32
    %75 = tpu.memref_slice %arg5[%c5_i32_54, %c0_i32_55] : memref<16x128xf32, #tpu.memory_space<vmem>> -> memref<1x128xf32, #tpu.memory_space<vmem>>
    tpu.wait_dma2 semaphore(%arg6 : memref<!tpu.dma_semaphore, #tpu.memory_space<semaphore_mem>>) src(%74 : memref<1x128xf32, #tpu.memory_space<any>>) dst(%75 : memref<1x128xf32, #tpu.memory_space<vmem>>)
    %c0_i32_56 = arith.constant 0 : i32
    %c0_i32_57 = arith.constant 0 : i32
    %76 = tpu.memref_slice %arg2[%c0_i32_56, %c0_i32_57] : memref<1000x128xf32, #tpu.memory_space<any>> -> memref<1x128xf32, #tpu.memory_space<any>>
    %c6_i32_58 = arith.constant 6 : i32
    %c0_i32_59 = arith.constant 0 : i32
    %77 = tpu.memref_slice %arg5[%c6_i32_58, %c0_i32_59] : memref<16x128xf32, #tpu.memory_space<vmem>> -> memref<1x128xf32, #tpu.memory_space<vmem>>
    tpu.wait_dma2 semaphore(%arg6 : memref<!tpu.dma_semaphore, #tpu.memory_space<semaphore_mem>>) src(%76 : memref<1x128xf32, #tpu.memory_space<any>>) dst(%77 : memref<1x128xf32, #tpu.memory_space<vmem>>)
    %c0_i32_60 = arith.constant 0 : i32
    %c0_i32_61 = arith.constant 0 : i32
    %78 = tpu.memref_slice %arg2[%c0_i32_60, %c0_i32_61] : memref<1000x128xf32, #tpu.memory_space<any>> -> memref<1x128xf32, #tpu.memory_space<any>>
    %c7_i32_62 = arith.constant 7 : i32
    %c0_i32_63 = arith.constant 0 : i32
    %79 = tpu.memref_slice %arg5[%c7_i32_62, %c0_i32_63] : memref<16x128xf32, #tpu.memory_space<vmem>> -> memref<1x128xf32, #tpu.memory_space<vmem>>
    tpu.wait_dma2 semaphore(%arg6 : memref<!tpu.dma_semaphore, #tpu.memory_space<semaphore_mem>>) src(%78 : memref<1x128xf32, #tpu.memory_space<any>>) dst(%79 : memref<1x128xf32, #tpu.memory_space<vmem>>)
    %c0_i32_64 = arith.constant 0 : i32
    %c0_i32_65 = arith.constant 0 : i32
    %80 = tpu.memref_slice %arg2[%c0_i32_64, %c0_i32_65] : memref<1000x128xf32, #tpu.memory_space<any>> -> memref<1x128xf32, #tpu.memory_space<any>>
    %c8_i32_66 = arith.constant 8 : i32
    %c0_i32_67 = arith.constant 0 : i32
    %81 = tpu.memref_slice %arg5[%c8_i32_66, %c0_i32_67] : memref<16x128xf32, #tpu.memory_space<vmem>> -> memref<1x128xf32, #tpu.memory_space<vmem>>
    tpu.wait_dma2 semaphore(%arg6 : memref<!tpu.dma_semaphore, #tpu.memory_space<semaphore_mem>>) src(%80 : memref<1x128xf32, #tpu.memory_space<any>>) dst(%81 : memref<1x128xf32, #tpu.memory_space<vmem>>)
    %c0_i32_68 = arith.constant 0 : i32
    %c0_i32_69 = arith.constant 0 : i32
    %82 = tpu.memref_slice %arg2[%c0_i32_68, %c0_i32_69] : memref<1000x128xf32, #tpu.memory_space<any>> -> memref<1x128xf32, #tpu.memory_space<any>>
    %c9_i32_70 = arith.constant 9 : i32
    %c0_i32_71 = arith.constant 0 : i32
    %83 = tpu.memref_slice %arg5[%c9_i32_70, %c0_i32_71] : memref<16x128xf32, #tpu.memory_space<vmem>> -> memref<1x128xf32, #tpu.memory_space<vmem>>
    tpu.wait_dma2 semaphore(%arg6 : memref<!tpu.dma_semaphore, #tpu.memory_space<semaphore_mem>>) src(%82 : memref<1x128xf32, #tpu.memory_space<any>>) dst(%83 : memref<1x128xf32, #tpu.memory_space<vmem>>)
    %c0_i32_72 = arith.constant 0 : i32
    %c0_i32_73 = arith.constant 0 : i32
    %84 = tpu.memref_slice %arg2[%c0_i32_72, %c0_i32_73] : memref<1000x128xf32, #tpu.memory_space<any>> -> memref<1x128xf32, #tpu.memory_space<any>>
    %c10_i32_74 = arith.constant 10 : i32
    %c0_i32_75 = arith.constant 0 : i32
    %85 = tpu.memref_slice %arg5[%c10_i32_74, %c0_i32_75] : memref<16x128xf32, #tpu.memory_space<vmem>> -> memref<1x128xf32, #tpu.memory_space<vmem>>
    tpu.wait_dma2 semaphore(%arg6 : memref<!tpu.dma_semaphore, #tpu.memory_space<semaphore_mem>>) src(%84 : memref<1x128xf32, #tpu.memory_space<any>>) dst(%85 : memref<1x128xf32, #tpu.memory_space<vmem>>)
    %c0_i32_76 = arith.constant 0 : i32
    %c0_i32_77 = arith.constant 0 : i32
    %86 = tpu.memref_slice %arg2[%c0_i32_76, %c0_i32_77] : memref<1000x128xf32, #tpu.memory_space<any>> -> memref<1x128xf32, #tpu.memory_space<any>>
    %c11_i32_78 = arith.constant 11 : i32
    %c0_i32_79 = arith.constant 0 : i32
    %87 = tpu.memref_slice %arg5[%c11_i32_78, %c0_i32_79] : memref<16x128xf32, #tpu.memory_space<vmem>> -> memref<1x128xf32, #tpu.memory_space<vmem>>
    tpu.wait_dma2 semaphore(%arg6 : memref<!tpu.dma_semaphore, #tpu.memory_space<semaphore_mem>>) src(%86 : memref<1x128xf32, #tpu.memory_space<any>>) dst(%87 : memref<1x128xf32, #tpu.memory_space<vmem>>)
    %c0_i32_80 = arith.constant 0 : i32
    %c0_i32_81 = arith.constant 0 : i32
    %88 = tpu.memref_slice %arg2[%c0_i32_80, %c0_i32_81] : memref<1000x128xf32, #tpu.memory_space<any>> -> memref<1x128xf32, #tpu.memory_space<any>>
    %c12_i32_82 = arith.constant 12 : i32
    %c0_i32_83 = arith.constant 0 : i32
    %89 = tpu.memref_slice %arg5[%c12_i32_82, %c0_i32_83] : memref<16x128xf32, #tpu.memory_space<vmem>> -> memref<1x128xf32, #tpu.memory_space<vmem>>
    tpu.wait_dma2 semaphore(%arg6 : memref<!tpu.dma_semaphore, #tpu.memory_space<semaphore_mem>>) src(%88 : memref<1x128xf32, #tpu.memory_space<any>>) dst(%89 : memref<1x128xf32, #tpu.memory_space<vmem>>)
    %c0_i32_84 = arith.constant 0 : i32
    %c0_i32_85 = arith.constant 0 : i32
    %90 = tpu.memref_slice %arg2[%c0_i32_84, %c0_i32_85] : memref<1000x128xf32, #tpu.memory_space<any>> -> memref<1x128xf32, #tpu.memory_space<any>>
    %c13_i32_86 = arith.constant 13 : i32
    %c0_i32_87 = arith.constant 0 : i32
    %91 = tpu.memref_slice %arg5[%c13_i32_86, %c0_i32_87] : memref<16x128xf32, #tpu.memory_space<vmem>> -> memref<1x128xf32, #tpu.memory_space<vmem>>
    tpu.wait_dma2 semaphore(%arg6 : memref<!tpu.dma_semaphore, #tpu.memory_space<semaphore_mem>>) src(%90 : memref<1x128xf32, #tpu.memory_space<any>>) dst(%91 : memref<1x128xf32, #tpu.memory_space<vmem>>)
    %c0_i32_88 = arith.constant 0 : i32
    %c0_i32_89 = arith.constant 0 : i32
    %92 = tpu.memref_slice %arg2[%c0_i32_88, %c0_i32_89] : memref<1000x128xf32, #tpu.memory_space<any>> -> memref<1x128xf32, #tpu.memory_space<any>>
    %c14_i32_90 = arith.constant 14 : i32
    %c0_i32_91 = arith.constant 0 : i32
    %93 = tpu.memref_slice %arg5[%c14_i32_90, %c0_i32_91] : memref<16x128xf32, #tpu.memory_space<vmem>> -> memref<1x128xf32, #tpu.memory_space<vmem>>
    tpu.wait_dma2 semaphore(%arg6 : memref<!tpu.dma_semaphore, #tpu.memory_space<semaphore_mem>>) src(%92 : memref<1x128xf32, #tpu.memory_space<any>>) dst(%93 : memref<1x128xf32, #tpu.memory_space<vmem>>)
    %c0_i32_92 = arith.constant 0 : i32
    %c0_i32_93 = arith.constant 0 : i32
    %94 = tpu.memref_slice %arg2[%c0_i32_92, %c0_i32_93] : memref<1000x128xf32, #tpu.memory_space<any>> -> memref<1x128xf32, #tpu.memory_space<any>>
    %c15_i32_94 = arith.constant 15 : i32
    %c0_i32_95 = arith.constant 0 : i32
    %95 = tpu.memref_slice %arg5[%c15_i32_94, %c0_i32_95] : memref<16x128xf32, #tpu.memory_space<vmem>> -> memref<1x128xf32, #tpu.memory_space<vmem>>
    tpu.wait_dma2 semaphore(%arg6 : memref<!tpu.dma_semaphore, #tpu.memory_space<semaphore_mem>>) src(%94 : memref<1x128xf32, #tpu.memory_space<any>>) dst(%95 : memref<1x128xf32, #tpu.memory_space<vmem>>)
    %c0_96 = arith.constant 0 : index
    %c0_97 = arith.constant 0 : index
    %96 = vector.load %arg5[%c0_96, %c0_97] : memref<16x128xf32, #tpu.memory_space<vmem>>, vector<16x128xf32>
    %c0_98 = arith.constant 0 : index
    %c0_99 = arith.constant 0 : index
    %97 = vector.load %arg3[%c0_98, %c0_99] : memref<16x128xf32, #tpu.memory_space<vmem>>, vector<16x128xf32>
    %98 = arith.addf %96, %97 : vector<16x128xf32>
    %c0_100 = arith.constant 0 : index
    %c0_101 = arith.constant 0 : index
    %c0_102 = arith.constant 0 : index
    %99 = vector.load %arg4[%c0_100, %c0_101, %c0_102] : memref<1x16x128xf32, #tpu.memory_space<vmem>>, vector<1x16x128xf32>
    %100 = vector.shape_cast %99 : vector<1x16x128xf32> to vector<16x128xf32>
    %101 = vector.shape_cast %98 : vector<16x128xf32> to vector<1x16x128xf32>
    tpu.vector_store %arg4[%c0_100, %c0_101, %c0_102], %101 {strides = array<i32>} : memref<1x16x128xf32, #tpu.memory_space<vmem>>, vector<1x16x128xf32>,
    return
  }
  func.func @transform_1(%arg0: i32, %arg1: memref<2x16xi32, #tpu.memory_space<smem>>) -> (i32, i32) {
    %c0_i32 = arith.constant 0 : i32
    %c0_i32_0 = arith.constant 0 : i32
    %c0_i32_1 = arith.constant 0 : i32
    return %c0_i32, %c0_i32_0 : i32, i32
  }
  func.func @transform_2(%arg0: i32, %arg1: memref<2x16xi32, #tpu.memory_space<smem>>) -> (i32, i32, i32) {
    %c0_i32 = arith.constant 0 : i32
    %c0_i32_0 = arith.constant 0 : i32
    %c0_i32_1 = arith.constant 0 : i32
    return %arg0, %c0_i32, %c0_i32_0 : i32, i32, i32
  }
}

</mosaic_0001>

<bundles_post_ra>
// kernel: tpu_custom_call.1
= control target key start
LH: loop header
LB: loop body
LE: loop exit
PB: predicated region body
PF: predicated region fallthrough
CT: control target
= control target key end

     0   :  { %s1580_s0 = inlined_call_operand.hbm [shape: s32[2,16], index: 0, kind: input, shape index: {}]   ;;  %s1581_s1 = inlined_call_operand.hbm [shape: f32[1000,128], index: 1, kind: input, shape index: {}]   ;;  %s1582_s2 = inlined_call_operand.hbm [shape: f32[16,128], index: 2, kind: input, shape index: {}]   ;;  %s1583_s3 = inlined_call_operand.hbm [shape: f32[2,16,128], index: 3, kind: output, shape index: {}]  }
   0x1   :  { %1589 = sst [smem:[#allocation50_spill]] %s1582_s2  ;;  %s627_s14 = scalar_lea.hbm %s1580_s0, 32 }
   0x2   :  { %p628_p0 = scmp.ne.s32.totalorder %s1580_s0, %s627_s14  ;;  %p631_p1 = scmp.lt.u32.totalorder %s627_s14, %s1580_s0 }
   0x4   :  { %p633_p2 = pnand %p631_p1, %p628_p0 }
   0x6   :  { %636 = shalt.err (!%p633_p2)  }
   0x7   :  { %s1121_s19 = smov [#allocation5]  }
   0x8   :  { %9 = dma.hbm_to_smem %s1580_s0, 32, %s1121_s19, [#allocation4] }
   0x9   :  { %1093 = dma.done.wait [#allocation4], 32 }
   0xa   :  { %1094 = vsyncadd [#allocation4], 4294967264 }
   0xb   :  { %11 = sfence }
   0xc   :  { %12 = vsyncpa [#allocation7], 0 }
   0xd   :  { %13 = vsyncpa [#allocation8], 0 }
   0xe   :  { %15 = vsyncpa [#allocation8 + $0x1], 0  ;;  %s1176_s22 = smov 0   ;;  %s1178_s23 = smov 0  }
   0xf   :  { %s1180_s24 = smov 0   ;;  %s1182_s25 = smov 0  }
  0x10 LB: > { %1590 = sst [smem:[#allocation48_spill]] %s1115_s24  ;;  %s1197_s0 = sadd.s32 4294967295, %s1119_s25   ;;  %s1119_s25 = sphi %s1182_s25, %s1607_s25   ;;  %s1115_s24 = sphi %s1180_s24, %s1604_s24   ;;  %s1111_s23 = sphi %s1178_s23, %s1606_s23   ;;  %s1107_s22 = sphi %s1176_s22, %s1605_s22  }
  0x11   : > { %s526_s26 = sadd.s32 4294967294, %s1119_s25   ;;  %s1201_s27 = sadd.s32 1, %s1119_s25  }
  0x12   : > { %s49_s28 = sadd.s32 1, %s1115_s24  ;;  %s46_s29 = ssub.s32 %s1119_s25, %s1201_s27 }
  0x13   : > { %p59_p3 = scmp.ne.s32.totalorder %s1115_s24, %s1111_s23  ;;  %p47_p4 = scmp.eq.s32.totalorder %s46_s29, 0 }
  0x14   : > { %p60_p5 = scmp.eq.s32.totalorder %s1197_s0, 1  ;;  %p65_p6 = scmp.ne.s32.totalorder %s1111_s23, %s1107_s22 }
  0x15   : > { %p66_p7 = scmp.eq.s32.totalorder %s526_s26, 1  ;;  %p527_p10 = scmp.ge.s32.totalorder %s1119_s25, 1 }
  0x16   : > { %s1212_s30 = scalar_select %p47_p4, %s1115_s24, %s49_s28  }
  0x17   : > { %p1214_p8 = por %p60_p5, %p59_p3  ;;  %p1218_p9 = por %p66_p7, %p65_p6 }
  0x18   : > { %1591 = sst [smem:[#allocation49_spill]] %s1212_s30  ;;  %p73_p11 = scmp.lt.s32.totalorder %s1119_s25, 3 }
  0x19   : > { %s1592_s4 = scalar_select %p1214_p8, 1, 0 }
  0x1a   : > { %s1593_s5 = scalar_select %p1218_p9, 1, 0 }
  0x1b   : > { %p1584_p12 = scmp.eq.s32.totalorder %s1197_s0, 0  ;;  %p1225_p13 = pnand %p527_p10, %p73_p11 }
  0x1c   : > { %s1122_s7 = smov [#allocation6]   ;;  %s1596_s2 = sld [smem:[#allocation50_spill]] }
  0x1d   : > { %s1594_s6 = scalar_select %p1225_p13, 1, 0 }
  0x1e   : > { %s85_s8 = sshll.u32 %s1122_s7, 4  ;;  %p562_p0 = pneg %p1225_p13  ;;  %s86_s8 = int_to_ptr.vmem [resolvable:$true] %s85_s8 }
  0x20   : > { %p1233_p1 = pnand %p1584_p12, %p562_p0 }
  0x22   : > { %s637_s12 = scalar_lea.hbm %s1596_s2, 256  ;;  %p639_p3 = pneg %p1233_p1 }
  0x23   : > { %p638_p2 = scmp.ne.s32.totalorder %s1596_s2, %s637_s12  ;;  %p644_p6 = scmp.lt.u32.totalorder %s637_s12, %s1596_s2 }
  0x25   : > { %p640_p4 = pnand %p639_p3, %p638_p2 }
  0x27   : > { %p641_p5 = pneg %p640_p4 }
  0x29   : > { %p646_p7 = pnand %p644_p6, %p641_p5 }
  0x2b   : > { %649 = shalt.err (!%p646_p7)
}
  0x2c   : > { %s650_s17 = scalar_lea.vmem %s86_s8, 256  ;;  %p658_p12 = scmp.lt.s32.totalorder %s86_s8, %s86_s8 }
  0x2d   : > { %p651_p10 = scmp.ne.s32.totalorder %s86_s8, %s650_s17  ;;  %p659_p9 = scmp.lt.s32.totalorder %s650_s17, %s650_s17 }
  0x2f   : > { %p653_p11 = pnand %p651_p10, %p639_p3  ;;  %p660_p8 = por %p659_p9, %p658_p12 }
  0x31   : > { %p654_p0 = pneg %p653_p11 }
  0x33   : > { %p661_p13 = pnand %p660_p8, %p654_p0 }
  0x35   : > { %664 = shalt.err (!%p661_p13)
}
  0x36   : > { %s1123_s18 = smov 128   ;;  %s1124_s19 = smov 8  }
  0x37   : > { %565 = dma.hbm_to_vmem [thread:$0]  (!%p1233_p1), %s1596_s2, 256, %s86_s8, [#allocation7], %s1123_s18, %s1123_s18, %s1124_s19  }
  0x38   : > { %p1597_p2 = scmp.ne.s32.totalorder %s1594_s6, 0 }
  0x39   : > { %p1598_p4 = scmp.eq.s32.totalorder (!%p1597_p2), %s1197_s0, 0 }
  0x3a   : > { %101 = sbr.rel (%p1597_p2) target bundleno = 456 (0x1c8), region = 24 }
  0x41   : > { %1096 = dma.done.wait (%p1598_p4), [#allocation7], 256   ;;  %p1599_p3 = pmov %p1598_p4 }
  0x42   : > { %s1587_s26 = sand.u32 1, %s1111_s23   ;;  %s1261_s28 = sshll.u32 %s1197_s0, 7 }
  0x43   : > { %1098 = vsyncadd (%p1599_p3), [#allocation7], 4294967040  ;;  %s1265_s29 = sshll.u32 %s1587_s26, 4  ;;  %s117_s6 = sld [smem:[#allocation5 + %s1261_s28]] }
  0x44   : > { %s1125_s7 = smov [#allocation2]   ;;  %s131_s9 = sadd.s32 1, %s1261_s28 }
  0x45   : > { %s127_s8 = sshll.u32 %s1125_s7, 4  ;;  %s1271_s10 = sld [smem:[#allocation5 + %s131_s9]]  ;;  %s1269_s8 = int_to_ptr.vmem [resolvable:$true] %s127_s8 }
  0x46   : > { %s147_s11 = sadd.s32 2, %s1261_s28  ;;  %s1126_s12 = smov [#allocation2 + $0x1]  }
  0x47   : > { %s143_s13 = sshll.u32 %s1126_s12, 4  ;;  %s1274_s14 = sld [smem:[#allocation5 + %s147_s11]]  ;;  %s1276_s13 = int_to_ptr.vmem [resolvable:$true] %s143_s13 }
  0x48   : > { %s1284_s7 = scalar_lea.hbm %s1581_s1, 16000 }
  0x49   : > { %s533_s15 = sshll.u32 %s117_s6, 4 }
  0x4a   : > { %s119_s18 = scalar_lea.hbm %s1581_s1, %s533_s15 }
  0x4b   : > { %s665_s19 = scalar_lea.hbm %s119_s18, 16  ;;  %p668_p9 = scmp.lt.u32.totalorder %s119_s18, %s1581_s1 }
  0x4c   : > { %p666_p8 = scmp.ne.s32.totalorder %s119_s18, %s665_s19  ;;  %p669_p12 = scmp.lt.u32.totalorder %s1284_s7, %s665_s19 }
  0x4d   : > { %p671_p1 = scmp.lt.u32.totalorder %s665_s19, %s119_s18 }
  0x4e   : > { %p670_p13 = por %p669_p12, %p668_p9 }
  0x50   : > { %p672_p5 = por %p671_p1, %p670_p13 }
  0x52   : > { %p673_p6 = pnand %p672_p5, %p666_p8 }
  0x54   : > { %676 = shalt.err (!%p673_p6)  }
  0x55   : > { %s677_s6 = scalar_lea.vmem %s1269_s8, 16  ;;  %s1293_s11 = scalar_lea.vmem %s1269_s8, 256 }
  0x56   : > { %p678_p7 = scmp.ne.s32.totalorder %s1269_s8, %s677_s6  ;;  %p682_p10 = scmp.lt.s32.totalorder %s1269_s8, %s1269_s8 }
  0x57   : > { %p683_p11 = scmp.lt.s32.totalorder %s1293_s11, %s677_s6 }
  0x59   : > { %p684_p0 = por %p683_p11, %p682_p10 }
  0x5b   : > { %p685_p2 = pnand %p684_p0, %p678_p7 }
  0x5d   : > { %688 = shalt.err (!%p685_p2)  }
  0x5e   : > { %130 = dma.hbm_to_vmem [thread:$0]  %s119_s18, 16, %s1269_s8, [#allocation3] }
  0x5f   : > { %s534_s26 = sshll.u32 %s1271_s10, 4  ;;  %s1127_s12 = smov [#allocation2 + $0x2]  }
  0x60   : > { %s159_s15 = sshll.u32 %s1127_s12, 4  ;;  %s134_s19 = scalar_lea.hbm %s1581_s1, %s534_s26  ;;  %s1303_s15 = int_to_ptr.vmem [resolvable:$true] %s159_s15 }
  0x61   : > { %s689_s20 = scalar_lea.hbm %s134_s19, 16  ;;  %p692_p3 = scmp.lt.u32.totalorder %s134_s19, %s1581_s1 }
  0x62   : > { %p690_p4 = scmp.ne.s32.totalorder %s134_s19, %s689_s20  ;;  %p693_p8 = scmp.lt.u32.totalorder %s1284_s7, %s689_s20 }
  0x63   : > { %p695_p12 = scmp.lt.u32.totalorder %s689_s20, %s134_s19 }
  0x64   : > { %p694_p9 = por %p693_p8, %p692_p3 }
  0x66   : > { %p696_p13 = por %p695_p12, %p694_p9 }
  0x68   : > { %p697_p1 = pnand %p696_p13, %p690_p4 }
  0x6a   : > { %700 = shalt.err (!%p697_p1)  }
  0x6b   : > { %s701_s10 = scalar_lea.vmem %s1276_s13, 16  ;;  %p706_p6 = scmp.lt.s32.totalorder %s1276_s13, %s1269_s8 }
  0x6c   : > { %p702_p5 = scmp.ne.s32.totalorder %s1276_s13, %s701_s10  ;;  %p707_p7 = scmp.lt.s32.totalorder %s1293_s11, %s701_s10 }
  0x6e   : > { %p708_p10 = por %p707_p7, %p706_p6 }
  0x70   : > { %p709_p11 = pnand %p708_p10, %p702_p5 }
  0x72   : > { %712 = shalt.err (!%p709_p11)  }
  0x73   : > { %146 = dma.hbm_to_vmem [thread:$0]  %s134_s19, 16, %s1276_s13, [#allocation3] }
  0x74   : > { %s535_s18 = sshll.u32 %s1274_s14, 4  ;;  %s163_s6 = sadd.s32 3, %s1261_s28 }
  0x75   : > { %s150_s16 = scalar_lea.hbm %s1581_s1, %s535_s18  ;;  %s1320_s17 = sld [smem:[#allocation5 + %s163_s6]] }
  0x76   : > { %s713_s20 = scalar_lea.hbm %s150_s16, 16  ;;  %p716_p2 = scmp.lt.u32.totalorder %s150_s16, %s1581_s1 }
  0x77   : > { %p714_p0 = scmp.ne.s32.totalorder %s150_s16, %s713_s20  ;;  %p717_p4 = scmp.lt.u32.totalorder %s1284_s7, %s713_s20 }
  0x78   : > { %p719_p8 = scmp.lt.u32.totalorder %s713_s20, %s150_s16 }
  0x79   : > { %p718_p3 = por %p717_p4, %p716_p2 }
  0x7b   : > { %p720_p9 = por %p719_p8, %p718_p3 }
  0x7d   : > { %p721_p12 = pnand %p720_p9, %p714_p0 }
  0x7f   : > { %724 = shalt.err (!%p721_p12)  }
  0x80   : > { %s725_s13 = scalar_lea.vmem %s1303_s15, 16  ;;  %p730_p1 = scmp.lt.s32.totalorder %s1303_s15, %s1269_s8 }
  0x81   : > { %p726_p13 = scmp.ne.s32.totalorder %s1303_s15, %s725_s13  ;;  %p731_p5 = scmp.lt.s32.totalorder %s1293_s11, %s725_s13 }
  0x83   : > { %p732_p6 = por %p731_p5, %p730_p1 }
  0x85   : > { %p733_p7 = pnand %p732_p6, %p726_p13 }
  0x87   : > { %736 = shalt.err (!%p733_p7)  }
  0x88   : > { %162 = dma.hbm_to_vmem [thread:$0]  %s150_s16, 16, %s1303_s15, [#allocation3] }
  0x89   : > { %s179_s14 = sadd.s32 4, %s1261_s28  ;;  %s1128_s19 = smov [#allocation2 + $0x3]  }
  0x8a   : > { %s175_s10 = sshll.u32 %s1128_s19, 4  ;;  %s180_s18 = sld [smem:[#allocation5 + %s179_s14]]  ;;  %s176_s10 = int_to_ptr.vmem [resolvable:$true] %s175_s10 }
  0x8b   : > { %s1129_s6 = smov [#allocation2 + $0x4]   ;;  %s195_s12 = sadd.s32 5, %s1261_s28 }
  0x8c   : > { %s191_s26 = sshll.u32 %s1129_s6, 4  ;;  %s536_s20 = sshll.u32 %s1320_s17, 4  ;;  %s1335_s26 = int_to_ptr.vmem [resolvable:$true] %s191_s26 }
  0x8d   : > { %s166_s13 = scalar_lea.hbm %s1581_s1, %s536_s20  ;;  %s1340_s2 = sld [smem:[#allocation5 + %s195_s12]] }
  0x8e   : > { %s737_s30 = scalar_lea.hbm %s166_s13, 16  ;;  %p740_p11 = scmp.lt.u32.totalorder %s166_s13, %s1581_s1 }
  0x8f   : > { %p738_p10 = scmp.ne.s32.totalorder %s166_s13, %s737_s30  ;;  %p741_p0 = scmp.lt.u32.totalorder %s1284_s7, %s737_s30 }
  0x90   : > { %p743_p4 = scmp.lt.u32.totalorder %s737_s30, %s166_s13 }
  0x91   : > { %p742_p2 = por %p741_p0, %p740_p11 }
  0x93   : > { %p744_p3 = por %p743_p4, %p742_p2 }
  0x95   : > { %p745_p8 = pnand %p744_p3, %p738_p10 }
  0x97   : > { %748 = shalt.err (!%p745_p8)  }
  0x98   : > { %s749_s17 = scalar_lea.vmem %s176_s10, 16  ;;  %p754_p12 = scmp.lt.s32.totalorder %s176_s10, %s1269_s8 }
  0x99   : > { %p750_p9 = scmp.ne.s32.totalorder %s176_s10, %s749_s17  ;;  %p755_p13 = scmp.lt.s32.totalorder %s1293_s11, %s749_s17 }
  0x9b   : > { %p756_p1 = por %p755_p13, %p754_p12 }
  0x9d   : > { %p757_p5 = pnand %p756_p1, %p750_p9 }
  0x9f   : > { %760 = shalt.err (!%p757_p5)  }
  0xa0   : > { %178 = dma.hbm_to_vmem [thread:$0]  %s166_s13, 16, %s176_s10, [#allocation3] }
  0xa1   : > { %s537_s14 = sshll.u32 %s180_s18, 4  ;;  %s1130_s30 = smov [#allocation2 + $0x5]  }
  0xa2   : > { %s182_s12 = scalar_lea.hbm %s1581_s1, %s537_s14  ;;  %s207_s20 = sshll.u32 %s1130_s30, 4  ;;  %s208_s20 = int_to_ptr.vmem [resolvable:$true] %s207_s20 }
  0xa3   : > { %s761_s21 = scalar_lea.hbm %s182_s12, 16  ;;  %p764_p7 = scmp.lt.u32.totalorder %s182_s12, %s1581_s1 }
  0xa4   : > { %p762_p6 = scmp.ne.s32.totalorder %s182_s12, %s761_s21  ;;  %p765_p10 = scmp.lt.u32.totalorder %s1284_s7, %s761_s21 }
  0xa5   : > { %p767_p0 = scmp.lt.u32.totalorder %s761_s21, %s182_s12 }
  0xa6   : > { %p766_p11 = por %p765_p10, %p764_p7 }
  0xa8   : > { %p768_p2 = por %p767_p0, %p766_p11 }
  0xaa   : > { %p769_p4 = pnand %p768_p2, %p762_p6 }
  0xac   : > { %772 = shalt.err (!%p769_p4)  }
  0xad   : > { %s773_s10 = scalar_lea.vmem %s1335_s26, 16  ;;  %p778_p8 = scmp.lt.s32.totalorder %s1335_s26, %s1269_s8 }
  0xae   : > { %p774_p3 = scmp.ne.s32.totalorder %s1335_s26, %s773_s10  ;;  %p779_p9 = scmp.lt.s32.totalorder %s1293_s11, %s773_s10 }
  0xb0   : > { %p780_p12 = por %p779_p9, %p778_p8 }
  0xb2   : > { %p781_p13 = pnand %p780_p12, %p774_p3 }
  0xb4   : > { %784 = shalt.err (!%p781_p13)  }
  0xb5   : > { %194 = dma.hbm_to_vmem [thread:$0]  %s182_s12, 16, %s1335_s26, [#allocation3] }
  0xb6   : > { %s211_s18 = sadd.s32 6, %s1261_s28  ;;  %s538_s13 = sshll.u32 %s1340_s2, 4 }
  0xb7   : > { %s1363_s16 = sld [smem:[#allocation5 + %s211_s18]]  ;;  %s198_s19 = scalar_lea.hbm %s1581_s1, %s538_s13 }
  0xb8   : > { %s785_s6 = scalar_lea.hbm %s198_s19, 16  ;;  %p788_p5 = scmp.lt.u32.totalorder %s198_s19, %s1581_s1 }
  0xb9   : > { %p786_p1 = scmp.ne.s32.totalorder %s198_s19, %s785_s6  ;;  %p789_p6 = scmp.lt.u32.totalorder %s1284_s7, %s785_s6 }
  0xba   : > { %p791_p10 = scmp.lt.u32.totalorder %s785_s6, %s198_s19 }
  0xbb   : > { %p790_p7 = por %p789_p6, %p788_p5 }
  0xbd   : > { %p792_p11 = por %p791_p10, %p790_p7 }
  0xbf   : > { %p793_p0 = pnand %p792_p11, %p786_p1 }
  0xc1   : > { %796 = shalt.err (!%p793_p0)  }
  0xc2   : > { %s797_s26 = scalar_lea.vmem %s208_s20, 16  ;;  %p802_p4 = scmp.lt.s32.totalorder %s208_s20, %s1269_s8 }
  0xc3   : > { %p798_p2 = scmp.ne.s32.totalorder %s208_s20, %s797_s26  ;;  %p803_p3 = scmp.lt.s32.totalorder %s1293_s11, %s797_s26 }
  0xc5   : > { %p804_p8 = por %p803_p3, %p802_p4 }
  0xc7   : > { %p805_p9 = pnand %p804_p8, %p798_p2 }
  0xc9   : > { %808 = shalt.err (!%p805_p9)  }
  0xca   : > { %210 = dma.hbm_to_vmem [thread:$0]  %s198_s19, 16, %s208_s20, [#allocation3] }
  0xcb   : > { %s1131_s2 = smov [#allocation2 + $0x6]   ;;  %s227_s9 = sadd.s32 7, %s1261_s28 }
  0xcc   : > { %s223_s12 = sshll.u32 %s1131_s2, 4  ;;  %s1375_s15 = sld [smem:[#allocation5 + %s227_s9]]  ;;  %s224_s12 = int_to_ptr.vmem [resolvable:$true] %s223_s12 }
  0xcd   : > { %s243_s10 = sadd.s32 8, %s1261_s28  ;;  %s539_s18 = sshll.u32 %s1363_s16, 4 }
  0xce   : > { %s1132_s13 = smov [#allocation2 + $0x7]   ;;  %s214_s30 = scalar_lea.hbm %s1581_s1, %s539_s18 }
  0xcf   : > { %s239_s17 = sshll.u32 %s1132_s13, 4  ;;  %s809_s20 = scalar_lea.hbm %s214_s30, 16  ;;  %s1382_s17 = int_to_ptr.vmem [resolvable:$true] %s239_s17 }
  0xd0   : > { %p810_p12 = scmp.ne.s32.totalorder %s214_s30, %s809_s20  ;;  %p812_p13 = scmp.lt.u32.totalorder %s214_s30, %s1581_s1 }
  0xd1   : > { %p813_p1 = scmp.lt.u32.totalorder %s1284_s7, %s809_s20  ;;  %p815_p6 = scmp.lt.u32.totalorder %s809_s20, %s214_s30 }
  0xd3   : > { %p814_p5 = por %p813_p1, %p812_p13 }
  0xd5   : > { %p816_p7 = por %p815_p6, %p814_p5 }
  0xd7   : > { %p817_p10 = pnand %p816_p7, %p810_p12 }
  0xd9   : > { %820 = shalt.err (!%p817_p10)  }
  0xda   : > { %s821_s16 = scalar_lea.vmem %s224_s12, 16  ;;  %p826_p0 = scmp.lt.s32.totalorder %s224_s12, %s1269_s8 }
  0xdb   : > { %p822_p11 = scmp.ne.s32.totalorder %s224_s12, %s821_s16  ;;  %p827_p2 = scmp.lt.s32.totalorder %s1293_s11, %s821_s16 }
  0xdd   : > { %p828_p4 = por %p827_p2, %p826_p0 }
  0xdf   : > { %p829_p3 = pnand %p828_p4, %p822_p11 }
  0xe1   : > { %832 = shalt.err (!%p829_p3)  }
  0xe2   : > { %226 = dma.hbm_to_vmem [thread:$0]  %s214_s30, 16, %s224_s12, [#allocation3] }
  0xe3   : > { %s1390_s26 = sld [smem:[#allocation5 + %s243_s10]]  ;;  %s540_s2 = sshll.u32 %s1375_s15, 4 }
  0xe4   : > { %s1133_s9 = smov [#allocation2 + $0x8]   ;;  %s230_s6 = scalar_lea.hbm %s1581_s1, %s540_s2 }
  0xe5   : > { %s255_s18 = sshll.u32 %s1133_s9, 4  ;;  %s833_s20 = scalar_lea.hbm %s230_s6, 16  ;;  %s1396_s18 = int_to_ptr.vmem [resolvable:$true] %s255_s18 }
  0xe6   : > { %p834_p8 = scmp.ne.s32.totalorder %s230_s6, %s833_s20  ;;  %p836_p9 = scmp.lt.u32.totalorder %s230_s6, %s1581_s1 }
  0xe7   : > { %p837_p12 = scmp.lt.u32.totalorder %s1284_s7, %s833_s20  ;;  %p839_p1 = scmp.lt.u32.totalorder %s833_s20, %s230_s6 }
  0xe9   : > { %p838_p13 = por %p837_p12, %p836_p9 }
  0xeb   : > { %p840_p5 = por %p839_p1, %p838_p13 }
  0xed   : > { %p841_p6 = pnand %p840_p5, %p834_p8 }
  0xef   : > { %844 = shalt.err (!%p841_p6)  }
  0xf0   : > { %s845_s12 = scalar_lea.vmem %s1382_s17, 16  ;;  %p850_p10 = scmp.lt.s32.totalorder %s1382_s17, %s1269_s8 }
  0xf1   : > { %p846_p7 = scmp.ne.s32.totalorder %s1382_s17, %s845_s12  ;;  %p851_p11 = scmp.lt.s32.totalorder %s1293_s11, %s845_s12 }
  0xf3   : > { %p852_p0 = por %p851_p11, %p850_p10 }
  0xf5   : > { %p853_p2 = pnand %p852_p0, %p846_p7 }
  0xf7   : > { %856 = shalt.err (!%p853_p2)  }
  0xf8   : > { %242 = dma.hbm_to_vmem [thread:$0]  %s230_s6, 16, %s1382_s17, [#allocation3] }
  0xf9   : > { %s259_s15 = sadd.s32 9, %s1261_s28  ;;  %s1134_s30 = smov [#allocation2 + $0x9]  }
  0xfa   : > { %s1409_s10 = sld [smem:[#allocation5 + %s259_s15]]  ;;  %s271_s16 = sshll.u32 %s1134_s30, 4  ;;  %s1412_s16 = int_to_ptr.vmem [resolvable:$true] %s271_s16 }
  0xfb   : > { %s541_s2 = sshll.u32 %s1390_s26, 4  ;;  %s275_s20 = sadd.s32 10, %s1261_s28 }
  0xfc   : > { %s246_s14 = scalar_lea.hbm %s1581_s1, %s541_s2 }
  0xfd   : > { %s857_s19 = scalar_lea.hbm %s246_s14, 16  ;;  %p860_p3 = scmp.lt.u32.totalorder %s246_s14, %s1581_s1 }
  0xfe   : > { %p858_p4 = scmp.ne.s32.totalorder %s246_s14, %s857_s19  ;;  %p861_p8 = scmp.lt.u32.totalorder %s1284_s7, %s857_s19 }
  0xff   : > { %p863_p12 = scmp.lt.u32.totalorder %s857_s19, %s246_s14 }
 0x100   : > { %p862_p9 = por %p861_p8, %p860_p3 }
 0x102   : > { %p864_p13 = por %p863_p12, %p862_p9 }
 0x104   : > { %p865_p1 = pnand %p864_p13, %p858_p4 }
 0x106   : > { %868 = shalt.err (!%p865_p1)  }
 0x107   : > { %s869_s17 = scalar_lea.vmem %s1396_s18, 16  ;;  %p874_p6 = scmp.lt.s32.totalorder %s1396_s18, %s1269_s8 }
 0x108   : > { %p870_p5 = scmp.ne.s32.totalorder %s1396_s18, %s869_s17  ;;  %p875_p7 = scmp.lt.s32.totalorder %s1293_s11, %s869_s17 }
 0x10a   : > { %p876_p10 = por %p875_p7, %p874_p6 }
 0x10c   : > { %p877_p11 = pnand %p876_p10, %p870_p5 }
 0x10e   : > { %880 = shalt.err (!%p877_p11)  }
 0x10f   : > { %258 = dma.hbm_to_vmem [thread:$0]  %s246_s14, 16, %s1396_s18, [#allocation3] }
 0x110   : > { %s1428_s26 = sld [smem:[#allocation5 + %s275_s20]]  ;;  %s1135_s6 = smov [#allocation2 + $0xa]  }
 0x111   : > { %s287_s15 = sshll.u32 %s1135_s6, 4  ;;  %s291_s30 = sadd.s32 11, %s1261_s28  ;;  %s1432_s15 = int_to_ptr.vmem [resolvable:$true] %s287_s15 }
 0x112   : > { %s542_s2 = sshll.u32 %s1409_s10, 4  ;;  %s1437_s21 = sld [smem:[#allocation5 + %s291_s30]] }
 0x113   : > { %s262_s19 = scalar_lea.hbm %s1581_s1, %s542_s2 }
 0x114   : > { %s881_s12 = scalar_lea.hbm %s262_s19, 16  ;;  %p884_p2 = scmp.lt.u32.totalorder %s262_s19, %s1581_s1 }
 0x115   : > { %p882_p0 = scmp.ne.s32.totalorder %s262_s19, %s881_s12  ;;  %p885_p4 = scmp.lt.u32.totalorder %s1284_s7, %s881_s12 }
 0x116   : > { %p887_p8 = scmp.lt.u32.totalorder %s881_s12, %s262_s19 }
 0x117   : > { %p886_p3 = por %p885_p4, %p884_p2 }
 0x119   : > { %p888_p9 = por %p887_p8, %p886_p3 }
 0x11b   : > { %p889_p12 = pnand %p888_p9, %p882_p0 }
 0x11d   : > { %892 = shalt.err (!%p889_p12)  }
 0x11e   : > { %s893_s18 = scalar_lea.vmem %s1412_s16, 16  ;;  %p898_p1 = scmp.lt.s32.totalorder %s1412_s16, %s1269_s8 }
 0x11f   : > { %p894_p13 = scmp.ne.s32.totalorder %s1412_s16, %s893_s18  ;;  %p899_p5 = scmp.lt.s32.totalorder %s1293_s11, %s893_s18 }
 0x121   : > { %p900_p6 = por %p899_p5, %p898_p1 }
 0x123   : > { %p901_p7 = pnand %p900_p6, %p894_p13 }
 0x125   : > { %904 = shalt.err (!%p901_p7)  }
 0x126   : > { %274 = dma.hbm_to_vmem [thread:$0]  %s262_s19, 16, %s1412_s16, [#allocation3] }
 0x127   : > { %s307_s24 = sadd.s32 12, %s1261_s28  ;;  %s543_s10 = sshll.u32 %s1428_s26, 4 }
 0x128   : > { %s1136_s14 = smov [#allocation2 + $0xb]   ;;  %s278_s2 = scalar_lea.hbm %s1581_s1, %s543_s10 }
 0x129   : > { %s303_s20 = sshll.u32 %s1136_s14, 4  ;;  %s905_s9 = scalar_lea.hbm %s278_s2, 16  ;;  %s1454_s20 = int_to_ptr.vmem [resolvable:$true] %s303_s20 }
 0x12a   : > { %p906_p10 = scmp.ne.s32.totalorder %s278_s2, %s905_s9  ;;  %p908_p11 = scmp.lt.u32.totalorder %s278_s2, %s1581_s1 }
 0x12b   : > { %p909_p0 = scmp.lt.u32.totalorder %s1284_s7, %s905_s9  ;;  %p911_p4 = scmp.lt.u32.totalorder %s905_s9, %s278_s2 }
 0x12d   : > { %p910_p2 = por %p909_p0, %p908_p11 }
 0x12f   : > { %p912_p3 = por %p911_p4, %p910_p2 }
 0x131   : > { %p913_p8 = pnand %p912_p3, %p906_p10 }
 0x133   : > { %916 = shalt.err (!%p913_p8)  }
 0x134   : > { %s917_s16 = scalar_lea.vmem %s1432_s15, 16  ;;  %p922_p12 = scmp.lt.s32.totalorder %s1432_s15, %s1269_s8 }
 0x135   : > { %p918_p9 = scmp.ne.s32.totalorder %s1432_s15, %s917_s16  ;;  %p923_p13 = scmp.lt.s32.totalorder %s1293_s11, %s917_s16 }
 0x137   : > { %p924_p1 = por %p923_p13, %p922_p12 }
 0x139   : > { %p925_p5 = pnand %p924_p1, %p918_p9 }
 0x13b   : > { %928 = shalt.err (!%p925_p5)  }
 0x13c   : > { %290 = dma.hbm_to_vmem [thread:$0]  %s278_s2, 16, %s1432_s15, [#allocation3] }
 0x13d   : > { %s544_s26 = sshll.u32 %s1437_s21, 4  ;;  %s1467_s19 = sld [smem:[#allocation5 + %s307_s24]] }
 0x13e   : > { %s294_s10 = scalar_lea.hbm %s1581_s1, %s544_s26 }
 0x13f   : > { %s929_s14 = scalar_lea.hbm %s294_s10, 16  ;;  %p932_p7 = scmp.lt.u32.totalorder %s294_s10, %s1581_s1 }
 0x140   : > { %p930_p6 = scmp.ne.s32.totalorder %s294_s10, %s929_s14  ;;  %p933_p10 = scmp.lt.u32.totalorder %s1284_s7, %s929_s14 }
 0x141   : > { %p935_p0 = scmp.lt.u32.totalorder %s929_s14, %s294_s10 }
 0x142   : > { %p934_p11 = por %p933_p10, %p932_p7 }
 0x144   : > { %p936_p2 = por %p935_p0, %p934_p11 }
 0x146   : > { %p937_p4 = pnand %p936_p2, %p930_p6 }
 0x148   : > { %940 = shalt.err (!%p937_p4)  }
 0x149   : > { %s941_s15 = scalar_lea.vmem %s1454_s20, 16  ;;  %p946_p8 = scmp.lt.s32.totalorder %s1454_s20, %s1269_s8 }
 0x14a   : > { %p942_p3 = scmp.ne.s32.totalorder %s1454_s20, %s941_s15  ;;  %p947_p9 = scmp.lt.s32.totalorder %s1293_s11, %s941_s15 }
 0x14c   : > { %p948_p12 = por %p947_p9, %p946_p8 }
 0x14e   : > { %p949_p13 = pnand %p948_p12, %p942_p3 }
 0x150   : > { %952 = shalt.err (!%p949_p13)  }
 0x151   : > { %306 = dma.hbm_to_vmem [thread:$0]  %s294_s10, 16, %s1454_s20, [#allocation3] }
 0x152   : > { %s1137_s21 = smov [#allocation2 + $0xc]   ;;  %s323_s2 = sadd.s32 13, %s1261_s28 }
 0x153   : > { %s319_s24 = sshll.u32 %s1137_s21, 4  ;;  %s324_s9 = sld [smem:[#allocation5 + %s323_s2]]  ;;  %s320_s24 = int_to_ptr.vmem [resolvable:$true] %s319_s24 }
 0x154   : > { %s339_s13 = sadd.s32 14, %s1261_s28  ;;  %s545_s12 = sshll.u32 %s1467_s19, 4 }
 0x155   : > { %s1138_s16 = smov [#allocation2 + $0xd]   ;;  %s310_s14 = scalar_lea.hbm %s1581_s1, %s545_s12 }
 0x156   : > { %s335_s26 = sshll.u32 %s1138_s16, 4  ;;  %s953_s6 = scalar_lea.hbm %s310_s14, 16  ;;  %s1488_s26 = int_to_ptr.vmem [resolvable:$true] %s335_s26 }
 0x157   : > { %p954_p1 = scmp.ne.s32.totalorder %s310_s14, %s953_s6  ;;  %p956_p5 = scmp.lt.u32.totalorder %s310_s14, %s1581_s1 }
 0x158   : > { %p957_p6 = scmp.lt.u32.totalorder %s1284_s7, %s953_s6  ;;  %p959_p10 = scmp.lt.u32.totalorder %s953_s6, %s310_s14 }
 0x15a   : > { %p958_p7 = por %p957_p6, %p956_p5 }
 0x15c   : > { %p960_p11 = por %p959_p10, %p958_p7 }
 0x15e   : > { %p961_p0 = pnand %p960_p11, %p954_p1 }
 0x160   : > { %964 = shalt.err (!%p961_p0)  }
 0x161   : > { %s965_s20 = scalar_lea.vmem %s320_s24, 16  ;;  %p970_p4 = scmp.lt.s32.totalorder %s320_s24, %s1269_s8 }
 0x162   : > { %p966_p2 = scmp.ne.s32.totalorder %s320_s24, %s965_s20  ;;  %p971_p3 = scmp.lt.s32.totalorder %s1293_s11, %s965_s20 }
 0x164   : > { %p972_p8 = por %p971_p3, %p970_p4 }
 0x166   : > { %p973_p9 = pnand %p972_p8, %p966_p2 }
 0x168   : > { %976 = shalt.err (!%p973_p9)  }
 0x169   : > { %322 = dma.hbm_to_vmem [thread:$0]  %s310_s14, 16, %s320_s24, [#allocation3] }
 0x16a   : > { %s340_s19 = sld [smem:[#allocation5 + %s339_s13]]  ;;  %s546_s10 = sshll.u32 %s324_s9, 4 }
 0x16b   : > { %s326_s12 = scalar_lea.hbm %s1581_s1, %s546_s10  ;;  %s1139_s16 = smov [#allocation2 + $0xe]  }
 0x16c   : > { %s351_s17 = sshll.u32 %s1139_s16, 4  ;;  %s977_s18 = scalar_lea.hbm %s326_s12, 16  ;;  %s352_s17 = int_to_ptr.vmem [resolvable:$true] %s351_s17 }
 0x16d   : > { %p978_p12 = scmp.ne.s32.totalorder %s326_s12, %s977_s18  ;;  %p980_p13 = scmp.lt.u32.totalorder %s326_s12, %s1581_s1 }
 0x16e   : > { %p981_p1 = scmp.lt.u32.totalorder %s1284_s7, %s977_s18  ;;  %p983_p6 = scmp.lt.u32.totalorder %s977_s18, %s326_s12 }
 0x170   : > { %p982_p5 = por %p981_p1, %p980_p13 }
 0x172   : > { %p984_p7 = por %p983_p6, %p982_p5 }
 0x174   : > { %p985_p10 = pnand %p984_p7, %p978_p12 }
 0x176   : > { %988 = shalt.err (!%p985_p10)  }
 0x177   : > { %s989_s24 = scalar_lea.vmem %s1488_s26, 16  ;;  %p994_p0 = scmp.lt.s32.totalorder %s1488_s26, %s1269_s8 }
 0x178   : > { %p990_p11 = scmp.ne.s32.totalorder %s1488_s26, %s989_s24  ;;  %p995_p2 = scmp.lt.s32.totalorder %s1293_s11, %s989_s24 }
 0x17a   : > { %p996_p4 = por %p995_p2, %p994_p0 }
 0x17c   : > { %p997_p3 = pnand %p996_p4, %p990_p11 }
 0x17e   : > { %1000 = shalt.err (!%p997_p3)  }
 0x17f   : > { %338 = dma.hbm_to_vmem [thread:$0]  %s326_s12, 16, %s1488_s26, [#allocation3] }
 0x180   : > { %s355_s9 = sadd.s32 15, %s1261_s28  ;;  %s547_s14 = sshll.u32 %s340_s19, 4 }
 0x181   : > { %s356_s13 = sld [smem:[#allocation5 + %s355_s9]]  ;;  %s342_s10 = scalar_lea.hbm %s1581_s1, %s547_s14 }
 0x182   : > { %s1140_s21 = smov [#allocation2 + $0xf]   ;;  %s1001_s16 = scalar_lea.hbm %s342_s10, 16 }
 0x183   : > { %s367_s2 = sshll.u32 %s1140_s21, 4  ;;  %p1002_p8 = scmp.ne.s32.totalorder %s342_s10, %s1001_s16  ;;  %s368_s2 = int_to_ptr.vmem [resolvable:$true] %s367_s2 }
 0x184   : > { %p1004_p9 = scmp.lt.u32.totalorder %s342_s10, %s1581_s1  ;;  %p1005_p12 = scmp.lt.u32.totalorder %s1284_s7, %s1001_s16 }
 0x185   : > { %p1007_p1 = scmp.lt.u32.totalorder %s1001_s16, %s342_s10 }
 0x186   : > { %p1006_p13 = por %p1005_p12, %p1004_p9 }
 0x188   : > { %p1008_p5 = por %p1007_p1, %p1006_p13 }
 0x18a   : > { %p1009_p6 = pnand %p1008_p5, %p1002_p8 }
 0x18c   : > { %1012 = shalt.err (!%p1009_p6)  }
 0x18d   : > { %s1013_s28 = scalar_lea.vmem %s352_s17, 16  ;;  %p1018_p10 = scmp.lt.s32.totalorder %s352_s17, %s1269_s8 }
 0x18e   : > { %p1014_p7 = scmp.ne.s32.totalorder %s352_s17, %s1013_s28  ;;  %p1019_p11 = scmp.lt.s32.totalorder %s1293_s11, %s1013_s28 }
 0x190   : > { %p1020_p0 = por %p1019_p11, %p1018_p10 }
 0x192   : > { %p1021_p2 = pnand %p1020_p0, %p1014_p7 }
 0x194   : > { %1024 = shalt.err (!%p1021_p2)  }
 0x195   : > { %354 = dma.hbm_to_vmem [thread:$0]  %s342_s10, 16, %s352_s17, [#allocation3] }
 0x196   : > { %s548_s26 = sshll.u32 %s356_s13, 4 }
 0x197   : > { %s358_s30 = scalar_lea.hbm %s1581_s1, %s548_s26 }
 0x198   : > { %s1025_s24 = scalar_lea.hbm %s358_s30, 16  ;;  %p1028_p3 = scmp.lt.u32.totalorder %s358_s30, %s1581_s1 }
 0x199   : > { %p1026_p4 = scmp.ne.s32.totalorder %s358_s30, %s1025_s24  ;;  %p1029_p8 = scmp.lt.u32.totalorder %s1284_s7, %s1025_s24 }
 0x19a   : > { %p1031_p12 = scmp.lt.u32.totalorder %s1025_s24, %s358_s30 }
 0x19b   : > { %p1030_p9 = por %p1029_p8, %p1028_p3 }
 0x19d   : > { %p1032_p13 = por %p1031_p12, %p1030_p9 }
 0x19f   : > { %p1033_p1 = pnand %p1032_p13, %p1026_p4 }
 0x1a1   : > { %1036 = shalt.err (!%p1033_p1)  }
 0x1a2   : > { %s1037_s17 = scalar_lea.vmem %s368_s2, 16  ;;  %p1042_p6 = scmp.lt.s32.totalorder %s368_s2, %s1269_s8 }
 0x1a3   : > { %p1038_p5 = scmp.ne.s32.totalorder %s368_s2, %s1037_s17  ;;  %p1043_p7 = scmp.lt.s32.totalorder %s1293_s11, %s1037_s17 }
 0x1a5   : > { %p1044_p10 = por %p1043_p7, %p1042_p6 }
 0x1a7   : > { %p1045_p11 = pnand %p1044_p10, %p1038_p5 }
 0x1a9   : > { %1048 = shalt.err (!%p1045_p11)  }
 0x1aa   : > { %370 = dma.hbm_to_vmem [thread:$0]  %s358_s30, 16, %s368_s2, [#allocation3] }
 0x1ab   : > { %s115_s13 = scalar_lea.vmem [#allocation9], %s1265_s29 }
 0x1ac   : > { %1099 = dma.done.wait [#allocation3], 256 }
 0x1ad   : > { %1100 = vsyncadd [#allocation3], 4294967040  ;;  %s555_s7 = sshll.u32 %s1197_s0, 8  ;;  %s426_s15 = sshll.u32 %s115_s13, 4  ;;  %v404_v0 = vld [vmem:[#allocation2] sm:$0xff]  ;;  %v406_v1 = vld [vmem:[#allocation6] sm:$0xff]  ;;  %s1535_s15 = int_to_ptr.vmem [resolvable:$true] %s426_s15 }
 0x1ae   : > { %v405_v2 = vld [vmem:[#allocation2 + $0x8] sm:$0xff]  ;;  %v408_v3 = vadd.f32 %v406_v1, %v404_v0  ;;  %v407_v4 = vld [vmem:[#allocation6 + $0x8] sm:$0xff]  ;;  %s1533_s20 = scalar_lea.hbm %s1583_s3, %s555_s7  ;;  %s1600_s0 = sand.u32 1, %s1111_s23  }
 0x1af   : > { %v409_v5 = vadd.f32 %v407_v4, %v405_v2  ;;  %s1539_s29 = scalar_lea.sflag [#allocation8], %s1600_s0  ;;  %s1049_s10 = scalar_lea.vmem %s1535_s15, 256 }
 0x1b0   : > { %410 = vst [vmem:[%s115_s13] sm:$0xff] %v408_v3  ;;  %p1050_p0 = scmp.ne.s32.totalorder %s1535_s15, %s1049_s10  ;;  %p1601_p2 = scmp.ne.s32.totalorder %s1592_s4, 0 }
 0x1b1   : > { %411 = vst [vmem:[%s115_s13 + $0x8] sm:$0xff] %v409_v5  ;;  %s1141_s21 = smov [#allocation9]  }
 0x1b2   : > { %p1051_p4 = pnand %p1050_p0, %p1601_p2  ;;  %s1053_s2 = sshll.u32 %s1141_s21, 4  ;;  %s1054_s2 = int_to_ptr.vmem [resolvable:$false] %s1053_s2 }
 0x1b3   : > { %s1055_s16 = scalar_lea.vmem %s1054_s2, 512  ;;  %p1056_p8 = scmp.lt.s32.totalorder %s1535_s15, %s1054_s2 }
 0x1b4   : > { %p1052_p3 = pneg %p1051_p4  ;;  %p1057_p9 = scmp.lt.s32.totalorder %s1055_s16, %s1049_s10 }
 0x1b6   : > { %p1058_p12 = por %p1057_p9, %p1056_p8 }
 0x1b8   : > { %p1059_p13 = pnand %p1058_p12, %p1052_p3 }
 0x1ba   : > { %1062 = shalt.err (!%p1059_p13)
}
 0x1bb   : > { %s1063_s18 = scalar_lea.hbm %s1533_s20, 256  ;;  %s1067_s26 = scalar_lea.hbm %s1583_s3, 512 }
 0x1bc   : > { %p1064_p1 = scmp.ne.s32.totalorder %s1533_s20, %s1063_s18  ;;  %p1068_p7 = scmp.lt.u32.totalorder %s1533_s20, %s1583_s3 }
 0x1bd   : > { %p1069_p10 = scmp.lt.u32.totalorder %s1067_s26, %s1063_s18  ;;  %p1071_p0 = scmp.lt.u32.totalorder %s1063_s18, %s1533_s20 }
 0x1be   : > { %p1065_p5 = pnand %p1064_p1, %p1601_p2 }
 0x1bf   : > { %p1070_p11 = por %p1069_p10, %p1068_p7 }
 0x1c0   : > { %p1066_p6 = pneg %p1065_p5 }
 0x1c1   : > { %p1072_p4 = por %p1071_p0, %p1070_p11 }
 0x1c3   : > { %p1073_p3 = pnand %p1072_p4, %p1066_p6 }
 0x1c5   : > { %1076 = shalt.err (!%p1073_p3)
}
 0x1c6   : > { %s1142_s30 = smov 128   ;;  %s1143_s24 = smov 8  }
 0x1c7   : > { %560 = dma.vmem_to_hbm [thread:$0]  (%p1601_p2), %s1535_s15, 256, %s1533_s20, %s1539_s29, %s1142_s30, %s1142_s30, %s1143_s24  }
 0x1c8 PF: > { %p572_p8 = scmp.ge.s32.totalorder %s1119_s25, 2  ;;  %s441_s9 = sand.u32 1, %s1107_s22  }
 0x1c9   : > { %p1602_p9 = scmp.ne.s32.totalorder %s1593_s5, 0  ;;  %s442_s14 = scalar_lea.sflag [#allocation8], %s441_s9 }
 0x1cb   : > { %p567_p12 = pnand %p572_p8, %p1602_p9 }
 0x1cd   : > { %1102 = dma.done.wait (!%p567_p12), %s442_s14, 256  }
 0x1ce   : > { %1104 = vsyncadd (!%p567_p12), %s442_s14, 4294967040  ;;  %s1603_s17 = sld [smem:[#allocation48_spill]]  ;;  %s1604_s24 = sld [smem:[#allocation49_spill]] }
 0x1cf   : > { %p18_p13 = scmp.ge.s32.totalorder %s1201_s27, 4   ;;  %s1605_s22 = smov %s1111_s23 }
 0x1d0   : > { %s1607_s25 = smov %s1201_s27 }
 0x1d1   :  { %20 = sbr.rel (!%p18_p13) target bundleno = 16 (0x10), region = 156 }
 0x1d4   : > { %s1606_s23 = smov %s1603_s17 }
 0x1d8   :  { %447 = vsyncpa [#allocation7], 1 }
 0x1d9   :  { %449 = vsyncpa [#allocation7 + $0x1], 1 }
 0x1da   :  { %450 = vsyncpa [#allocation8], 1 }
 0x1db   :  { %452 = vsyncpa [#allocation8 + $0x1], 1 }
 0x1dc   :  { %453 = vsyncmov [#allocation3] }
 0x1df   :  { %s454_s25 = vpop.sfrf %453 }
 0x1e0   :  { %p554_p2 = scmp.ne.s32.totalorder %s454_s25, 0 }
 0x1e2   :  { %458 = shalt.err (%p554_p2)  }

</bundles_post_ra>
